<compile_context>
chip_gen: v7x
topology: tpu7x:2x2x1
jax: 0.10.0
libtpu: 0.0.40
codegen_flags: <defaults>
</compile_context>

<pallas_src>
import functools

import jax
import jax.numpy as jnp
import numpy as np
from jax.experimental import pallas as pl
from jax.experimental.pallas import tpu as pltpu


def _round_up(x, m):
    return ((x + m - 1) // m) * m


def _mlp_kernel(x_ref, *refs, n_layers):
    # refs = (w0_ref, ..., w{L-1}_ref, o_ref); weights are row-packed
    # block-diagonal bf16, x is the f32 packed tile [tile, P*d_in].
    w_refs = refs[:n_layers]
    o_ref = refs[n_layers]

    # Cast to bf16 in-kernel (hidden under MXU) instead of a standalone XLA
    # convert pass over x in HBM.
    h = x_ref[...].astype(jnp.bfloat16)
    # Hidden layers: bf16 MXU matmul, f32 accumulation, ReLU on f32 (safe on
    # v5e's f32-only VPU), back to bf16 for the next MXU pass.
    for li in range(n_layers - 1):
        acc = jnp.dot(h, w_refs[li][...], preferred_element_type=jnp.float32)
        h = jnp.maximum(acc, 0.0).astype(jnp.bfloat16)
    # Output layer: no activation; lane-dense f32 store ([tile, P*d_out_pad]).
    o_ref[...] = jnp.dot(h, w_refs[-1][...], preferred_element_type=jnp.float32)


def prepare_mlp_params(weights):
    """One-time parameter prep.

    weights[i] is the PyTorch-layout weight (out_i, in_i).
    Chooses a row-packing factor P (128 // feature_width when it divides 128),
    zero-pads the final output dim to 128/P lanes, block-diagonalizes every
    transposed weight by P and casts to bf16.

    Returns (packed_weights, P, d_in, d_out, d_out_pad).
    """
    wts_io = [np.asarray(w, np.float32).T for w in weights]  # (in, out)
    d_in = int(wts_io[0].shape[0])
    d_out = int(wts_io[-1].shape[1])

    # Packing factor: every matmul width except the (padded) final output.
    feat = max([w.shape[0] for w in wts_io] + [w.shape[1] for w in wts_io[:-1]])
    P = 128 // feat if (feat <= 128 and 128 % feat == 0) else 1

    # Pad the final output dim so the packed output width is lane-dense
    # (P * d_out_pad == multiple of 128 when P > 1); with P == 1 fall back to
    # sublane-multiple padding (full-array last dim -> legal masked store).
    lane = (128 // P) if P > 1 else 8
    d_out_pad = _round_up(d_out, lane)
    w_last = np.zeros((wts_io[-1].shape[0], d_out_pad), np.float32)
    w_last[:, :d_out] = wts_io[-1]
    wts_io[-1] = w_last

    packed = []
    for w in wts_io:
        di, do = w.shape
        if P == 1:
            wp = w
        else:
            wp = np.zeros((P * di, P * do), np.float32)
            for j in range(P):
                wp[j * di:(j + 1) * di, j * do:(j + 1) * do] = w
        packed.append(jnp.asarray(wp, jnp.bfloat16))
    return packed, P, d_in, d_out, d_out_pad


def mlp_forward(x, params, *, tile_rows=1024):
    """Run the fused MLP.

    x:      [N, n_input_dims] (cast like .to(torch.float32); bf16 cast happens
            in-kernel, so no extra HBM convert pass)
    params: output of prepare_mlp_params
    returns [N, n_output_dims] float32
    """
    wts, P, d_in, d_out, d_out_pad = params
    n_layers = len(wts)

    x = jnp.asarray(x, jnp.float32)
    N = int(x.shape[0])

    # Row-pack: [N, d_in] -> [N/P, P*d_in] (free view for contiguous x).
    # Pad at most P-1 rows when N % P != 0; no pad-to-tile (grid uses cdiv
    # and the ragged last tile's out-of-bounds output rows are dropped).
    n_rows = _round_up(N, P)
    if n_rows != N:
        x = jnp.pad(x, ((0, n_rows - N), (0, 0)))
    n_packed = n_rows // P
    xp = x.reshape(n_packed, P * d_in)

    # Tile sizing (in packed rows): big tiles to amortize per-step overhead,
    # but keep >= ~4-8 grid steps for large batches so the pipeline can hide
    # DMA and both v7x TensorCores get work.  Multiple of 16 (bf16 sublanes).
    tile = min(int(tile_rows), n_packed)
    if n_packed >= 1024:
        tile = min(tile, pl.cdiv(n_packed, 8))
    elif n_packed >= 256:
        tile = min(tile, pl.cdiv(n_packed, 4))
    tile = max(16, _round_up(tile, 16))

    grid = (pl.cdiv(n_packed, tile),)

    in_specs = [pl.BlockSpec((tile, P * d_in), lambda i: (i, 0))]
    for w in wts:
        # Full-array block, constant index_map -> weight stays VMEM-resident
        # across all grid iterations (each is only ~32 KiB bf16 after packing).
        in_specs.append(pl.BlockSpec(w.shape, lambda i: (0, 0)))

    out_width = P * d_out_pad
    out = pl.pallas_call(
        functools.partial(_mlp_kernel, n_layers=n_layers),
        out_shape=jax.ShapeDtypeStruct((n_packed, out_width), jnp.float32),
        grid_spec=pltpu.PrefetchScalarGridSpec(
            num_scalar_prefetch=0,
            grid=grid,
            in_specs=in_specs,
            out_specs=pl.BlockSpec((tile, out_width), lambda i: (i, 0)),
        ),
        compiler_params=pltpu.CompilerParams(
            dimension_semantics=("parallel",)),
    )(xp, *wts)

    # [n_packed, P*d_out_pad] -> [n_rows, d_out_pad] is a free contiguous
    # reshape; the final slice now touches a slab ~16x smaller than a
    # (N, 128) padded output would.
    return out.reshape(n_rows, d_out_pad)[:N, :d_out]


def kaiming_uniform_relu(key, out_features, in_features):
    """nn.init.kaiming_uniform_(w, nonlinearity='relu') for weight (out, in)."""
    bound = float(np.sqrt(6.0 / in_features))
    return jax.random.uniform(key, (out_features, in_features),
                              dtype=jnp.float32, minval=-bound, maxval=bound)


def make_mlp_weights(key, cfg):
    """Deterministic parameter init matching _MLP._mlp_net layer shapes."""
    dims = ([cfg["n_input_dims"]]
            + [cfg["n_neurons"]] * cfg["n_hidden_layers"]
            + [cfg["n_output_dims"]])
    weights = []
    for i in range(len(dims) - 1):
        key, sub = jax.random.split(key)
        weights.append(kaiming_uniform_relu(sub, dims[i + 1], dims[i]))
    return weights


def mlp_reference_f32(x, weights):
    """Pure-JAX f32 reference mirroring nn.Sequential(Linear, ReLU, ..., Linear)."""
    h = jnp.asarray(x, jnp.float32)
    for i, w in enumerate(weights):
        h = h @ jnp.asarray(w, jnp.float32).T
        if i < len(weights) - 1:
            h = jnp.maximum(h, 0.0)
    return h


def mlp_reference_bf16(x, weights):
    """Pure-JAX reference matching the kernel's bf16-input / f32-accumulate math."""
    h = jnp.asarray(x, jnp.float32).astype(jnp.bfloat16)
    for i, w in enumerate(weights):
        wt = jnp.asarray(w, jnp.float32).T.astype(jnp.bfloat16)
        h = jnp.dot(h, wt, preferred_element_type=jnp.float32)
        if i < len(weights) - 1:
            h = jnp.maximum(h, 0.0).astype(jnp.bfloat16)
    return h


if __name__ == "__main__":
    cfg = {
        "n_input_dims": 32,
        "n_output_dims": 3,
        "n_neurons": 32,
        "n_hidden_layers": 2,
    }

    key = jax.random.PRNGKey(0)
    k_w, k_x = jax.random.split(key)

    weights = make_mlp_weights(k_w, cfg)
    params = prepare_mlp_params(weights)

    # N intentionally not a multiple of the packing factor or the tile size, to
    # exercise both the tiny P-pad and the ragged-last-tile paths.
    N = 1003
    x = jax.random.normal(k_x, (N, cfg["n_input_dims"]), dtype=jnp.float32)

    out = mlp_forward(x, params)
    out = jax.block_until_ready(out)
    assert out.shape == (N, cfg["n_output_dims"])
    assert bool(jnp.all(jnp.isfinite(out)))

    # Tight check against a reference using the same bf16-input / f32-acc math
    # (the block-diagonal packing only adds exact zeros to each accumulation).
    ref_bf16 = mlp_reference_bf16(x, weights)
    np.testing.assert_allclose(np.asarray(out), np.asarray(ref_bf16),
                               rtol=1e-2, atol=1e-2)

    # Loose sanity check against the full-f32 PyTorch-equivalent reference
    # (bf16 matmul inputs -> relaxed tolerance).
    ref_f32 = mlp_reference_f32(x, weights)
    np.testing.assert_allclose(np.asarray(out), np.asarray(ref_f32),
                               rtol=1e-1, atol=1e-1)

    # TODO(synk): loss_scale only affects a registered backward hook (gradient
    # scaling); there is no forward-pass equivalent to implement.
    print("KERNEL_OK")
</pallas_src>

<mosaic_0001>
module attributes {stable_mosaic.version = 11 : i64} {
  func.func @_mlp_kernel(%arg0: i32, %arg1: memref<256x128xf32, #tpu.memory_space<vmem>>, %arg2: memref<128x128xbf16, #tpu.memory_space<vmem>>, %arg3: memref<128x128xbf16, #tpu.memory_space<vmem>>, %arg4: memref<128x128xbf16, #tpu.memory_space<vmem>>, %arg5: memref<256x128xf32, #tpu.memory_space<vmem>>) attributes {dimension_semantics = [#tpu.dimension_semantics<parallel>], iteration_bounds = array<i64: 1>, scalar_prefetch = 0 : i64, scratch_operands = 0 : i64, tpu.core_type = #tpu.core_type<tc>, window_params = [{transform_indices = @transform_0, window_bounds = array<i64: 256, 128>}, {pipeline_mode = #tpu.pipeline_mode<synchronous>, transform_indices = @transform_1, window_bounds = array<i64: 128, 128>}, {pipeline_mode = #tpu.pipeline_mode<synchronous>, transform_indices = @transform_2, window_bounds = array<i64: 128, 128>}, {pipeline_mode = #tpu.pipeline_mode<synchronous>, transform_indices = @transform_3, window_bounds = array<i64: 128, 128>}, {transform_indices = @transform_4, window_bounds = array<i64: 256, 128>}]} {
    %c0 = arith.constant 0 : index
    %c0_0 = arith.constant 0 : index
    %0 = vector.load %arg1[%c0, %c0_0] : memref<256x128xf32, #tpu.memory_space<vmem>>, vector<256x128xf32>
    %1 = arith.truncf %0 : vector<256x128xf32> to vector<256x128xbf16>
    %c0_1 = arith.constant 0 : index
    %c0_2 = arith.constant 0 : index
    %2 = vector.load %arg2[%c0_1, %c0_2] : memref<128x128xbf16, #tpu.memory_space<vmem>>, vector<128x128xbf16>
    %cst = arith.constant dense<0.000000e+00> : vector<256x128xf32>
    %3 = tpu.matmul %1, %2, %cst {dimension_numbers = #tpu.dot_dimension_numbers<[1], [0], [0], [1], [0, 0, 1, 1], [], []>} : vector<256x128xbf16>, vector<128x128xbf16>, vector<256x128xf32> -> vector<256x128xf32>
    %cst_3 = arith.constant 0.000000e+00 : f32
    %4 = vector.broadcast %cst_3 : f32 to vector<256x128xf32>
    %5 = arith.maximumf %3, %4 : vector<256x128xf32>
    %6 = arith.truncf %5 : vector<256x128xf32> to vector<256x128xbf16>
    %c0_4 = arith.constant 0 : index
    %c0_5 = arith.constant 0 : index
    %7 = vector.load %arg3[%c0_4, %c0_5] : memref<128x128xbf16, #tpu.memory_space<vmem>>, vector<128x128xbf16>
    %cst_6 = arith.constant dense<0.000000e+00> : vector<256x128xf32>
    %8 = tpu.matmul %6, %7, %cst_6 {dimension_numbers = #tpu.dot_dimension_numbers<[1], [0], [0], [1], [0, 0, 1, 1], [], []>} : vector<256x128xbf16>, vector<128x128xbf16>, vector<256x128xf32> -> vector<256x128xf32>
    %cst_7 = arith.constant 0.000000e+00 : f32
    %9 = vector.broadcast %cst_7 : f32 to vector<256x128xf32>
    %10 = arith.maximumf %8, %9 : vector<256x128xf32>
    %11 = arith.truncf %10 : vector<256x128xf32> to vector<256x128xbf16>
    %c0_8 = arith.constant 0 : index
    %c0_9 = arith.constant 0 : index
    %12 = vector.load %arg4[%c0_8, %c0_9] : memref<128x128xbf16, #tpu.memory_space<vmem>>, vector<128x128xbf16>
    %cst_10 = arith.constant dense<0.000000e+00> : vector<256x128xf32>
    %13 = tpu.matmul %11, %12, %cst_10 {dimension_numbers = #tpu.dot_dimension_numbers<[1], [0], [0], [1], [0, 0, 1, 1], [], []>} : vector<256x128xbf16>, vector<128x128xbf16>, vector<256x128xf32> -> vector<256x128xf32>
    %c0_11 = arith.constant 0 : index
    %c0_12 = arith.constant 0 : index
    %14 = vector.load %arg5[%c0_11, %c0_12] : memref<256x128xf32, #tpu.memory_space<vmem>>, vector<256x128xf32>
    tpu.vector_store %arg5[%c0_11, %c0_12], %13 {strides = array<i32>} : memref<256x128xf32, #tpu.memory_space<vmem>>, vector<256x128xf32>,
    return
  }
  func.func @transform_0(%arg0: i32) -> (i32, i32) {
    %c0_i32 = arith.constant 0 : i32
    %c0_i32_0 = arith.constant 0 : i32
    return %arg0, %c0_i32 : i32, i32
  }
  func.func @transform_1(%arg0: i32) -> (i32, i32) {
    %c0_i32 = arith.constant 0 : i32
    %c0_i32_0 = arith.constant 0 : i32
    %c0_i32_1 = arith.constant 0 : i32
    return %c0_i32, %c0_i32_0 : i32, i32
  }
  func.func @transform_2(%arg0: i32) -> (i32, i32) {
    %c0_i32 = arith.constant 0 : i32
    %c0_i32_0 = arith.constant 0 : i32
    %c0_i32_1 = arith.constant 0 : i32
    return %c0_i32, %c0_i32_0 : i32, i32
  }
  func.func @transform_3(%arg0: i32) -> (i32, i32) {
    %c0_i32 = arith.constant 0 : i32
    %c0_i32_0 = arith.constant 0 : i32
    %c0_i32_1 = arith.constant 0 : i32
    return %c0_i32, %c0_i32_0 : i32, i32
  }
  func.func @transform_4(%arg0: i32) -> (i32, i32) {
    %c0_i32 = arith.constant 0 : i32
    %c0_i32_0 = arith.constant 0 : i32
    return %arg0, %c0_i32 : i32, i32
  }
}

</mosaic_0001>

<bundles_post_ra>
// kernel: tpu_custom_call.1
= control target key start
LH: loop header
LB: loop body
LE: loop exit
PB: predicated region body
PF: predicated region fallthrough
CT: control target
= control target key end

     0   :  { %9 = vsyncpa [#allocation3], 0  ;;  %s1473_s0 = inlined_call_operand.hbm [shape: f32[251,128], index: 0, kind: input, shape index: {}]   ;;  %s1474_s1 = inlined_call_operand.hbm [shape: bf16[128,128], index: 1, kind: input, shape index: {}]   ;;  %s1475_s2 = inlined_call_operand.hbm [shape: bf16[128,128], index: 2, kind: input, shape index: {}]   ;;  %s1476_s3 = inlined_call_operand.hbm [shape: bf16[128,128], index: 3, kind: input, shape index: {}]   ;;  %s1477_s4 = inlined_call_operand.hbm [shape: f32[251,128], index: 4, kind: output, shape index: {}]  }
   0x1   :  { %10 = vsyncpa [#allocation6], 0 }
   0x2   :  { %11 = vsyncpa [#allocation9], 0 }
   0x3   :  { %12 = vsyncpa [#allocation4], 0  ;;  %s1351_s15 = smov [#allocation5]   ;;  %s1233_s19 = scalar_lea.hbm %s1474_s1, 1024 }
   0x4   :  { %s30_s16 = sshll.u32 %s1351_s15, 4  ;;  %p1234_p0 = scmp.ne.s32.totalorder %s1474_s1, %s1233_s19  ;;  %s31_s16 = int_to_ptr.vmem [resolvable:$true] %s30_s16 }
   0x5   :  { %p1237_p1 = scmp.lt.u32.totalorder %s1233_s19, %s1474_s1 }
   0x7   :  { %p1239_p2 = pnand %p1237_p1, %p1234_p0 }
   0x9   :  { %1242 = shalt.err (!%p1239_p2)
}
   0xa   :  { %s1243_s24 = scalar_lea.vmem %s31_s16, 1024  ;;  %p1248_p4 = scmp.lt.s32.totalorder %s31_s16, %s31_s16 }
   0xb   :  { %p1244_p3 = scmp.ne.s32.totalorder %s31_s16, %s1243_s24  ;;  %p1249_p5 = scmp.lt.s32.totalorder %s1243_s24, %s1243_s24 }
   0xd   :  { %p1250_p6 = por %p1249_p5, %p1248_p4 }
   0xf   :  { %p1251_p7 = pnand %p1250_p6, %p1244_p3 }
  0x11   :  { %1254 = shalt.err (!%p1251_p7)
}
  0x12   :  { %s1352_s25 = smov 64   ;;  %s1353_s26 = smov 4  }
  0x13   :  { %36 = dma.hbm_to_vmem [thread:$0]  %s1474_s1, 1024, %s31_s16, [#allocation6], %s1352_s25, %s1352_s25, %s1353_s26  }
  0x14   :  { %s1354_s29 = smov [#allocation2]   ;;  %s1255_s7 = scalar_lea.hbm %s1473_s0, 4096 }
  0x15   :  { %s18_s30 = sshll.u32 %s1354_s29, 4  ;;  %p1256_p8 = scmp.ne.s32.totalorder %s1473_s0, %s1255_s7  ;;  %s19_s30 = int_to_ptr.vmem [resolvable:$true] %s18_s30 }
  0x16   :  { %p1259_p9 = scmp.lt.u32.totalorder %s1255_s7, %s1473_s0 }
  0x18   :  { %p1261_p10 = pnand %p1259_p9, %p1256_p8 }
  0x1a   :  { %1264 = shalt.err (!%p1261_p10)
}
  0x1b   :  { %s1265_s12 = scalar_lea.vmem %s19_s30, 4096  ;;  %p1270_p12 = scmp.lt.s32.totalorder %s19_s30, %s19_s30 }
  0x1c   :  { %p1266_p11 = scmp.ne.s32.totalorder %s19_s30, %s1265_s12  ;;  %p1271_p13 = scmp.lt.s32.totalorder %s1265_s12, %s1265_s12 }
  0x1e   :  { %p1272_p0 = por %p1271_p13, %p1270_p12 }
  0x20   :  { %p1273_p1 = pnand %p1272_p0, %p1266_p11 }
  0x22   :  { %1276 = shalt.err (!%p1273_p1)
}
  0x23   :  { %s1355_s1 = smov 128   ;;  %s1356_s13 = smov 8  }
  0x24   :  { %24 = dma.hbm_to_vmem [thread:$0]  %s1473_s0, 4096, %s19_s30, [#allocation3], %s1355_s1, %s1355_s1, %s1356_s13  }
  0x25   :  { %s1357_s16 = smov [#allocation7]   ;;  %s1358_s18 = smov [#allocation8]  }
  0x26   :  { %s42_s17 = sshll.u32 %s1357_s16, 4  ;;  %s54_s19 = sshll.u32 %s1358_s18, 4  ;;  %s43_s17 = int_to_ptr.vmem [resolvable:$true] %s42_s17  ;;  %s1415_s19 = int_to_ptr.vmem [resolvable:$true] %s54_s19 }
  0x27   :  { %s1277_s22 = scalar_lea.hbm %s1475_s2, 1024 }
  0x28   :  { %p1278_p2 = scmp.ne.s32.totalorder %s1475_s2, %s1277_s22  ;;  %p1281_p3 = scmp.lt.u32.totalorder %s1277_s22, %s1475_s2 }
  0x2a   :  { %p1283_p4 = pnand %p1281_p3, %p1278_p2 }
  0x2c   :  { %1286 = shalt.err (!%p1283_p4)
}
  0x2d   :  { %s1287_s0 = scalar_lea.vmem %s43_s17, 1024  ;;  %p1292_p6 = scmp.lt.s32.totalorder %s43_s17, %s43_s17 }
  0x2e   :  { %p1288_p5 = scmp.ne.s32.totalorder %s43_s17, %s1287_s0  ;;  %p1293_p7 = scmp.lt.s32.totalorder %s1287_s0, %s1287_s0 }
  0x30   :  { %p1294_p8 = por %p1293_p7, %p1292_p6 }
  0x32   :  { %p1295_p9 = pnand %p1294_p8, %p1288_p5 }
  0x34   :  { %1298 = shalt.err (!%p1295_p9)
}
  0x35   :  { %48 = dma.hbm_to_vmem [thread:$0]  %s1475_s2, 1024, %s43_s17, [#allocation6], %s1352_s25, %s1352_s25, %s1353_s26  }
  0x36   :  { %s1299_s7 = scalar_lea.hbm %s1476_s3, 1024 }
  0x37   :  { %p1300_p10 = scmp.ne.s32.totalorder %s1476_s3, %s1299_s7  ;;  %p1303_p11 = scmp.lt.u32.totalorder %s1299_s7, %s1476_s3 }
  0x39   :  { %p1305_p12 = pnand %p1303_p11, %p1300_p10 }
  0x3b   :  { %1308 = shalt.err (!%p1305_p12)
}
  0x3c   :  { %s1309_s12 = scalar_lea.vmem %s1415_s19, 1024  ;;  %p1314_p0 = scmp.lt.s32.totalorder %s1415_s19, %s1415_s19 }
  0x3d   :  { %p1310_p13 = scmp.ne.s32.totalorder %s1415_s19, %s1309_s12  ;;  %p1315_p1 = scmp.lt.s32.totalorder %s1309_s12, %s1309_s12 }
  0x3f   :  { %p1316_p2 = por %p1315_p1, %p1314_p0 }
  0x41   :  { %p1317_p3 = pnand %p1316_p2, %p1310_p13 }
  0x43   :  { %1320 = shalt.err (!%p1317_p3)
}
  0x44   :  { %60 = dma.hbm_to_vmem [thread:$0]  %s1476_s3, 1024, %s1415_s19, [#allocation9], %s1352_s25, %s1352_s25, %s1353_s26  }
  0x45   :  { %1343 = dma.done.wait [#allocation3], 4096  }
  0x46   :  { %1344 = vsyncadd [#allocation3], 4294963200 }
  0x47   :  { %1345 = dma.done.wait [#allocation6], 2048  }
  0x48   :  { %1346 = vsyncadd [#allocation6], 4294965248 }
  0x49   :  { %1347 = dma.done.wait [#allocation9], 1024  }
  0x4a   :  { %1348 = vsyncadd [#allocation9], 4294966272  ;;  %v1209_v0 = vld [vmem:[#allocation5] sm:$0xff]   ;;  %v1210_v1 = vld [vmem:[#allocation5 + $0x8] sm:$0xff]   ;;  %s1359_s3 = smov [#allocation10]  }
  0x4b   :  { %1040 = vmatprep.subr.bf16.mxu0 %v1209_v0  ;;  %1184 = vmatprep.subr.bf16.mxu1 %v1209_v0  ;;  %v1211_v2 = vld [vmem:[#allocation5 + $0x10] sm:$0xff]   ;;  %v1212_v3 = vld [vmem:[#allocation5 + $0x18] sm:$0xff]   ;;  %v74_v4 = vld [vmem:[#allocation2] sm:$0xff]  ;;  %s930_s25 = sshll.u32 %s1359_s3, 4  ;;  %s931_s25 = int_to_ptr.vmem [resolvable:$true] %s930_s25 }
  0x4c   :  { %1041 = vmatpush3.bf16.msra.mxu0 %v1209_v0  ;;  %1192 = vmatpush3.bf16.msra.mxu1 %v1209_v0  ;;  %v75_v5 = vld [vmem:[#allocation2 + $0x8] sm:$0xff]  ;;  %v1213_v7 = vld [vmem:[#allocation5 + $0x20] sm:$0xff]   ;;  %v1215_v12 = vld [vmem:[#allocation5 + $0x30] sm:$0xff]   ;;  %s1321_s26 = scalar_lea.vmem %s931_s25, 4096  ;;  %p1326_p5 = scmp.lt.s32.totalorder %s931_s25, %s931_s25 }
  0x4d   :  { %1042 = vmatprep.subr.bf16.mxu0 %v1210_v1  ;;  %1185 = vmatprep.subr.bf16.mxu1 %v1210_v1  ;;  %v106_v6 = vpack.c.bf16 %v75_v5, %v74_v4  ;;  %v90_v8 = vld [vmem:[#allocation2 + $0x80] sm:$0xff]  ;;  %v91_v9 = vld [vmem:[#allocation2 + $0x88] sm:$0xff]  ;;  %v1216_v13 = vld [vmem:[#allocation5 + $0x38] sm:$0xff]   ;;  %p1322_p4 = scmp.ne.s32.totalorder %s931_s25, %s1321_s26  ;;  %p1327_p6 = scmp.lt.s32.totalorder %s1321_s26, %s1321_s26 }
  0x4e   :  { %v114_v10 = vpack.c.bf16 %v91_v9, %v90_v8  ;;  %v1214_v11 = vld [vmem:[#allocation5 + $0x28] sm:$0xff]   ;;  %v76_v14 = vld [vmem:[#allocation2 + $0x10] sm:$0xff]  ;;  %v77_v15 = vld [vmem:[#allocation2 + $0x18] sm:$0xff] }
  0x4f   :  { %1056 = vmatprep.mubr.bf16.mxu0 %v106_v6  ;;  %v78_v16 = vld [vmem:[#allocation2 + $0x20] sm:$0xff]  ;;  %v79_v17 = vld [vmem:[#allocation2 + $0x28] sm:$0xff]  ;;  %v92_v18 = vld [vmem:[#allocation2 + $0x90] sm:$0xff]  ;;  %v107_v23 = vpack.c.bf16 %v77_v15, %v76_v14  ;;  %p1328_p7 = por %p1327_p6, %p1326_p5 }
  0x50   :  { %1043 = vmatpush3.bf16.msra.mxu0 %v1210_v1  ;;  %1193 = vmatpush3.bf16.msra.mxu1 %v1210_v1  ;;  %v93_v19 = vld [vmem:[#allocation2 + $0x98] sm:$0xff]  ;;  %v94_v20 = vld [vmem:[#allocation2 + $0xa0] sm:$0xff]  ;;  %v95_v21 = vld [vmem:[#allocation2 + $0xa8] sm:$0xff]  ;;  %v108_v24 = vpack.c.bf16 %v79_v17, %v78_v16 }
  0x51   :  { %1044 = vmatprep.subr.bf16.mxu0 %v1211_v2  ;;  %1186 = vmatprep.subr.bf16.mxu1 %v1211_v2  ;;  %v1217_v22 = vld [vmem:[#allocation7] sm:$0xff]   ;;  %v115_v25 = vpack.c.bf16 %v93_v19, %v92_v18  ;;  %v116_v26 = vpack.c.bf16 %v95_v21, %v94_v20  ;;  %v1218_v27 = vld [vmem:[#allocation7 + $0x8] sm:$0xff]   ;;  %v80_v28 = vld [vmem:[#allocation2 + $0x30] sm:$0xff]  ;;  %p1329_p8 = pnand %p1328_p7, %p1322_p4 }
  0x52   :  { %1072 = vmatprep.mubr.bf16.mxu1 %v114_v10  ;;  %v81_v29 = vld [vmem:[#allocation2 + $0x38] sm:$0xff]  ;;  %v82_v30 = vld [vmem:[#allocation2 + $0x40] sm:$0xff]  ;;  %v83_v31 = vld [vmem:[#allocation2 + $0x48] sm:$0xff] }
  0x53   :  { %v96_v32 = vld [vmem:[#allocation2 + $0xb0] sm:$0xff]  ;;  %v97_v33 = vld [vmem:[#allocation2 + $0xb8] sm:$0xff]  ;;  %v98_v34 = vld [vmem:[#allocation2 + $0xc0] sm:$0xff]  ;;  %v109_v37 = vpack.c.bf16 %v81_v29, %v80_v28  ;;  %v110_v38 = vpack.c.bf16 %v83_v31, %v82_v30 }
  0x54   :  { %1045 = vmatpush3.bf16.msra.mxu0 %v1211_v2  ;;  %1194 = vmatpush3.bf16.msra.mxu1 %v1211_v2  ;;  %v99_v35 = vld [vmem:[#allocation2 + $0xc8] sm:$0xff]  ;;  %v1219_v36 = vld [vmem:[#allocation7 + $0x10] sm:$0xff]   ;;  %v117_v39 = vpack.c.bf16 %v97_v33, %v96_v32  ;;  %v1220_v41 = vld [vmem:[#allocation7 + $0x18] sm:$0xff]  }
  0x55   :  { %1046 = vmatprep.subr.bf16.mxu0 %v1212_v3  ;;  %1187 = vmatprep.subr.bf16.mxu1 %v1212_v3  ;;  %v118_v40 = vpack.c.bf16 %v99_v35, %v98_v34  ;;  %v84_v42 = vld [vmem:[#allocation2 + $0x50] sm:$0xff]  ;;  %v85_v43 = vld [vmem:[#allocation2 + $0x58] sm:$0xff]  ;;  %v86_v44 = vld [vmem:[#allocation2 + $0x60] sm:$0xff] }
  0x56   :  { %v87_v45 = vld [vmem:[#allocation2 + $0x68] sm:$0xff]  ;;  %v100_v46 = vld [vmem:[#allocation2 + $0xd0] sm:$0xff]  ;;  %v101_v47 = vld [vmem:[#allocation2 + $0xd8] sm:$0xff]  ;;  %v111_v51 = vpack.c.bf16 %v85_v43, %v84_v42 }
  0x57   :  { %v102_v48 = vld [vmem:[#allocation2 + $0xe0] sm:$0xff]  ;;  %v103_v49 = vld [vmem:[#allocation2 + $0xe8] sm:$0xff]  ;;  %v112_v52 = vpack.c.bf16 %v87_v45, %v86_v44  ;;  %v119_v53 = vpack.c.bf16 %v101_v47, %v100_v46  ;;  %v88_v56 = vld [vmem:[#allocation2 + $0x70] sm:$0xff] }
  0x58   :  { %1047 = vmatpush3.bf16.msra.mxu0 %v1212_v3  ;;  %1195 = vmatpush3.bf16.msra.mxu1 %v1212_v3  ;;  %v1221_v50 = vld [vmem:[#allocation7 + $0x20] sm:$0xff]   ;;  %v120_v54 = vpack.c.bf16 %v103_v49, %v102_v48  ;;  %v1222_v55 = vld [vmem:[#allocation7 + $0x28] sm:$0xff]   ;;  %v89_v57 = vld [vmem:[#allocation2 + $0x78] sm:$0xff] }
  0x59   :  { %1048 = vmatprep.subr.bf16.mxu0 %v1213_v7  ;;  %1188 = vmatprep.subr.bf16.mxu1 %v1213_v7  ;;  %v104_v58 = vld [vmem:[#allocation2 + $0xf0] sm:$0xff]  ;;  %v105_v59 = vld [vmem:[#allocation2 + $0xf8] sm:$0xff]  ;;  %v113_v60 = vpack.c.bf16 %v89_v57, %v88_v56  ;;  %v1225_v0 = vld [vmem:[#allocation8] sm:$0xff]  }
  0x5a   :  { %v121_v61 = vpack.c.bf16 %v105_v59, %v104_v58  ;;  %v1223_v62 = vld [vmem:[#allocation7 + $0x30] sm:$0xff]   ;;  %v1224_v63 = vld [vmem:[#allocation7 + $0x38] sm:$0xff]   ;;  %v1226_v1 = vld [vmem:[#allocation8 + $0x8] sm:$0xff]  }
  0x5b   :  { %v1227_v2 = vld [vmem:[#allocation8 + $0x10] sm:$0xff]   ;;  %v1228_v3 = vld [vmem:[#allocation8 + $0x18] sm:$0xff]   ;;  %v1229_v4 = vld [vmem:[#allocation8 + $0x20] sm:$0xff]  }
  0x5c   :  { %1049 = vmatpush3.bf16.msra.mxu0 %v1213_v7  ;;  %1196 = vmatpush3.bf16.msra.mxu1 %v1213_v7  ;;  %v1230_v5 = vld [vmem:[#allocation8 + $0x28] sm:$0xff]  }
  0x5d   :  { %1050 = vmatprep.subr.bf16.mxu0 %v1214_v11  ;;  %1189 = vmatprep.subr.bf16.mxu1 %v1214_v11 }
  0x60   :  { %1051 = vmatpush3.bf16.msra.mxu0 %v1214_v11  ;;  %1197 = vmatpush3.bf16.msra.mxu1 %v1214_v11 }
  0x61   :  { %1052 = vmatprep.subr.bf16.mxu0 %v1215_v12  ;;  %1190 = vmatprep.subr.bf16.mxu1 %v1215_v12 }
  0x64   :  { %1053 = vmatpush3.bf16.msra.mxu0 %v1215_v12  ;;  %1198 = vmatpush3.bf16.msra.mxu1 %v1215_v12 }
  0x65   :  { %1054 = vmatprep.subr.bf16.mxu0 %v1216_v13  ;;  %1191 = vmatprep.subr.bf16.mxu1 %v1216_v13 }
  0x68   :  { %1055 = vmatpush3.bf16.msra.mxu0 %v1216_v13  ;;  %1199 = vmatpush3.bf16.msra.mxu1 %v1216_v13 }
  0x69   :  { %1088 = vmatprep.subr.bf16.mxu1 %v1217_v22  ;;  %1136 = vmatprep.subr.bf16.mxu0 %v1225_v0 }
  0x6b   :  { %1057 = vmatmul.mubr.bf16.vlgmr.msra.gmra.mrb[0].mxu0 %v107_v23  ;;  %1073 = vmatmul.mubr.bf16.vlgmr.msra.gmra.mrb[0].mxu1 %v115_v25 }
  0x6c   :  { %1060 = vmatprep.mubr.bf16.mxu0 %v108_v24  ;;  %1076 = vmatprep.mubr.bf16.mxu1 %v116_v26 }
  0x6d   :  { %1089 = vmatpush3.bf16.msra.mxu1 %v1217_v22  ;;  %1137 = vmatpush3.bf16.msra.mxu0 %v1225_v0 }
  0x6e   :  { %1090 = vmatprep.subr.bf16.mxu1 %v1218_v27  ;;  %1138 = vmatprep.subr.bf16.mxu0 %v1226_v1 }
  0x71   :  { %1091 = vmatpush3.bf16.msra.mxu1 %v1218_v27  ;;  %1139 = vmatpush3.bf16.msra.mxu0 %v1226_v1 }
  0x72   :  { %1092 = vmatprep.subr.bf16.mxu1 %v1219_v36  ;;  %1140 = vmatprep.subr.bf16.mxu0 %v1227_v2 }
  0x73   :  { %1061 = vmatmul.mubr.bf16.gmra.mrb[4].mxu0 %v109_v37  ;;  %1077 = vmatmul.mubr.bf16.gmra.mrb[4].mxu1 %v117_v39 }
  0x74   :  { %1064 = vmatprep.mubr.bf16.mxu0 %v110_v38  ;;  %1080 = vmatprep.mubr.bf16.mxu1 %v118_v40 }
  0x75   :  { %1093 = vmatpush3.bf16.msra.mxu1 %v1219_v36  ;;  %1141 = vmatpush3.bf16.msra.mxu0 %v1227_v2 }
  0x76   :  { %1094 = vmatprep.subr.bf16.mxu1 %v1220_v41  ;;  %1142 = vmatprep.subr.bf16.mxu0 %v1228_v3 }
  0x79   :  { %1095 = vmatpush3.bf16.msra.mxu1 %v1220_v41  ;;  %1143 = vmatpush3.bf16.msra.mxu0 %v1228_v3 }
  0x7a   :  { %1096 = vmatprep.subr.bf16.mxu1 %v1221_v50  ;;  %1144 = vmatprep.subr.bf16.mxu0 %v1229_v4 }
  0x7b   :  { %1065 = vmatmul.mubr.bf16.gmra.mrb[8].mxu0 %v111_v51  ;;  %1081 = vmatmul.mubr.bf16.gmra.mrb[8].mxu1 %v119_v53 }
  0x7c   :  { %1068 = vmatprep.mubr.bf16.mxu0 %v112_v52  ;;  %1084 = vmatprep.mubr.bf16.mxu1 %v120_v54 }
  0x7d   :  { %1097 = vmatpush3.bf16.msra.mxu1 %v1221_v50  ;;  %1145 = vmatpush3.bf16.msra.mxu0 %v1229_v4 }
  0x7e   :  { %1098 = vmatprep.subr.bf16.mxu1 %v1222_v55  ;;  %1146 = vmatprep.subr.bf16.mxu0 %v1230_v5 }
  0x81   :  { %1099 = vmatpush3.bf16.msra.mxu1 %v1222_v55  ;;  %1147 = vmatpush3.bf16.msra.mxu0 %v1230_v5 }
  0x82   :  { %1100 = vmatprep.subr.bf16.mxu1 %v1223_v62 }
  0x83   :  { %1069 = vmatmul.mubr.bf16.gmra.mrb[12].mxu0 %v113_v60  ;;  %1085 = vmatmul.mubr.bf16.gmra.mrb[12].mxu1 %v121_v61 }
  0x85   :  { %1101 = vmatpush3.bf16.msra.mxu1 %v1223_v62 }
  0x86   :  { %1102 = vmatprep.subr.bf16.mxu1 %v1224_v63 }
  0x89   :  { %1103 = vmatpush3.bf16.msra.mxu1 %v1224_v63 }
 0x13e   :  { %v1058_v6 = vpop.f32.mrb[0].mxu0  ;;  %v1074_v8 = vpop.f32.mrb[0].mxu1 }
 0x13f   :  { %v220_v7 = vpop.f32.mrb[1].mxu0  ;;  %v365_v10 = vmax.f32 %v1074_v8, 0.0  ;;  %v284_v11 = vpop.f32.mrb[1].mxu1  ;;  %v349_v12 = vmax.f32 %v1058_v6, 0.0 }
 0x140   :  { %v1059_v9 = vpop.f32.mrb[2].mxu0  ;;  %v363_v15 = vmax.f32 %v284_v11, 0.0  ;;  %v1075_v16 = vpop.f32.mrb[2].mxu1  ;;  %v347_v17 = vmax.f32 %v220_v7, 0.0 }
 0x141   :  { %v350_v13 = vmax.f32 %v1059_v9, 0.0  ;;  %v223_v14 = vpop.f32.mrb[3].mxu0  ;;  %v366_v19 = vmax.f32 %v1075_v16, 0.0  ;;  %v287_v20 = vpop.f32.mrb[3].mxu1 }
 0x142   :  { %v348_v18 = vmax.f32 %v223_v14, 0.0  ;;  %v364_v22 = vmax.f32 %v287_v20, 0.0 }
 0x143   :  { %v380_v21 = vpack.c.bf16 %v350_v13, %v349_v12  ;;  %v1452_v24 = vpack.c.bf16 %v366_v19, %v365_v10 }
 0x144   :  { %v379_v23 = vpack.c.bf16 %v348_v18, %v347_v17  ;;  %v1454_v25 = vpack.c.bf16 %v364_v22, %v363_v15  ;;  %v1231_v22 = vld [vmem:[#allocation8 + $0x30] sm:$0xff]  }
 0x145   :  { %1148 = vmatprep.subr.bf16.mxu0 %v1231_v22 }
 0x146   :  { %v1062_v26 = vpop.f32.mrb[4].mxu0  ;;  %1104 = vmatprep.mubr.bf16.mxu1 %v379_v23  ;;  %v1078_v28 = vpop.f32.mrb[4].mxu1  ;;  %1149 = vmatpush3.bf16.msra.mxu0 %v1231_v22  ;;  %v1232_v23 = vld [vmem:[#allocation8 + $0x38] sm:$0xff]  }
 0x147   :  { %v236_v27 = vpop.f32.mrb[5].mxu0  ;;  %1105 = vmatmul.mubr.bf16.vlgmr.msra.gmra.mrb[16].mxu1 %v380_v21  ;;  %v369_v30 = vmax.f32 %v1078_v28, 0.0  ;;  %v300_v31 = vpop.f32.mrb[5].mxu1  ;;  %v353_v32 = vmax.f32 %v1062_v26, 0.0  ;;  %1150 = vmatprep.subr.bf16.mxu0 %v1232_v23 }
 0x148   :  { %v1063_v29 = vpop.f32.mrb[6].mxu0  ;;  %v367_v35 = vmax.f32 %v300_v31, 0.0  ;;  %v1079_v36 = vpop.f32.mrb[6].mxu1  ;;  %v351_v37 = vmax.f32 %v236_v27, 0.0 }
 0x149   :  { %v354_v33 = vmax.f32 %v1063_v29, 0.0  ;;  %v239_v34 = vpop.f32.mrb[7].mxu0  ;;  %v370_v39 = vmax.f32 %v1079_v36, 0.0  ;;  %v303_v40 = vpop.f32.mrb[7].mxu1 }
 0x14a   :  { %v352_v38 = vmax.f32 %v239_v34, 0.0  ;;  %v368_v42 = vmax.f32 %v303_v40, 0.0  ;;  %1151 = vmatpush3.bf16.msra.mxu0 %v1232_v23 }
 0x14b   :  { %v382_v41 = vpack.c.bf16 %v354_v33, %v353_v32  ;;  %v390_v44 = vpack.c.bf16 %v370_v39, %v369_v30 }
 0x14c   :  { %v381_v43 = vpack.c.bf16 %v352_v38, %v351_v37  ;;  %v389_v45 = vpack.c.bf16 %v368_v42, %v367_v35 }
 0x14e   :  { %v1066_v46 = vpop.f32.mrb[8].mxu0  ;;  %1108 = vmatprep.mubr.bf16.mxu1 %v381_v43  ;;  %v1082_v48 = vpop.f32.mrb[8].mxu1 }
 0x14f   :  { %v252_v47 = vpop.f32.mrb[9].mxu0  ;;  %1109 = vmatmul.mubr.bf16.gmra.mrb[20].mxu1 %v382_v41  ;;  %v373_v50 = vmax.f32 %v1082_v48, 0.0  ;;  %v316_v51 = vpop.f32.mrb[9].mxu1  ;;  %v357_v52 = vmax.f32 %v1066_v46, 0.0 }
 0x150   :  { %v1067_v49 = vpop.f32.mrb[10].mxu0  ;;  %v371_v55 = vmax.f32 %v316_v51, 0.0  ;;  %v1083_v56 = vpop.f32.mrb[10].mxu1  ;;  %v355_v57 = vmax.f32 %v252_v47, 0.0 }
 0x151   :  { %v358_v53 = vmax.f32 %v1067_v49, 0.0  ;;  %v255_v54 = vpop.f32.mrb[11].mxu0  ;;  %v374_v59 = vmax.f32 %v1083_v56, 0.0  ;;  %v319_v60 = vpop.f32.mrb[11].mxu1 }
 0x152   :  { %v356_v58 = vmax.f32 %v255_v54, 0.0  ;;  %v372_v62 = vmax.f32 %v319_v60, 0.0 }
 0x153   :  { %v384_v61 = vpack.c.bf16 %v358_v53, %v357_v52  ;;  %v392_v0 = vpack.c.bf16 %v374_v59, %v373_v50 }
 0x154   :  { %v383_v63 = vpack.c.bf16 %v356_v58, %v355_v57  ;;  %v391_v1 = vpack.c.bf16 %v372_v62, %v371_v55 }
 0x156   :  { %v1070_v2 = vpop.f32.mrb[12].mxu0  ;;  %1112 = vmatprep.mubr.bf16.mxu1 %v383_v63  ;;  %v1086_v4 = vpop.f32.mrb[12].mxu1 }
 0x157   :  { %v268_v3 = vpop.f32.mrb[13].mxu0  ;;  %1113 = vmatmul.mubr.bf16.gmra.mrb[24].mxu1 %v384_v61  ;;  %v377_v6 = vmax.f32 %v1086_v4, 0.0  ;;  %v332_v7 = vpop.f32.mrb[13].mxu1  ;;  %v361_v8 = vmax.f32 %v1070_v2, 0.0 }
 0x158   :  { %v1071_v5 = vpop.f32.mrb[14].mxu0  ;;  %v375_v11 = vmax.f32 %v332_v7, 0.0  ;;  %v1087_v12 = vpop.f32.mrb[14].mxu1  ;;  %v359_v13 = vmax.f32 %v268_v3, 0.0 }
 0x159   :  { %v362_v9 = vmax.f32 %v1071_v5, 0.0  ;;  %v271_v10 = vpop.f32.mrb[15].mxu0  ;;  %v378_v15 = vmax.f32 %v1087_v12, 0.0  ;;  %v335_v16 = vpop.f32.mrb[15].mxu1 }
 0x15a   :  { %v360_v14 = vmax.f32 %v271_v10, 0.0  ;;  %v376_v18 = vmax.f32 %v335_v16, 0.0 }
 0x15b   :  { %v386_v17 = vpack.c.bf16 %v362_v9, %v361_v8  ;;  %v394_v20 = vpack.c.bf16 %v378_v15, %v377_v6 }
 0x15c   :  { %v385_v19 = vpack.c.bf16 %v360_v14, %v359_v13  ;;  %v393_v21 = vpack.c.bf16 %v376_v18, %v375_v11 }
 0x15e   :  { %1116 = vmatprep.mubr.bf16.mxu1 %v385_v19 }
 0x15f   :  { %1117 = vmatmul.mubr.bf16.gmra.mrb[28].mxu1 %v386_v17 }
 0x160   :  { %1120 = vmatprep.mubr.bf16.mxu1 %v1454_v25 }
 0x167   :  { %1121 = vmatmul.mubr.bf16.gmra.mrb[32].mxu1 %v1452_v24 }
 0x168   :  { %1124 = vmatprep.mubr.bf16.mxu1 %v389_v45 }
 0x16f   :  { %1125 = vmatmul.mubr.bf16.gmra.mrb[36].mxu1 %v390_v44 }
 0x170   :  { %1128 = vmatprep.mubr.bf16.mxu1 %v391_v1 }
 0x177   :  { %1129 = vmatmul.mubr.bf16.gmra.mrb[40].mxu1 %v392_v0 }
 0x178   :  { %1132 = vmatprep.mubr.bf16.mxu1 %v393_v21 }
 0x17f   :  { %1133 = vmatmul.mubr.bf16.gmra.mrb[44].mxu1 %v394_v20 }
 0x21a   :  { %v1106_v26 = vpop.f32.mrb[16].mxu1 }
 0x21b   :  { %v493_v27 = vpop.f32.mrb[17].mxu1  ;;  %v622_v29 = vmax.f32 %v1106_v26, 0.0 }
 0x21c   :  { %v1107_v28 = vpop.f32.mrb[18].mxu1  ;;  %v620_v31 = vmax.f32 %v493_v27, 0.0 }
 0x21d   :  { %v623_v30 = vmax.f32 %v1107_v28, 0.0  ;;  %v496_v25 = vpop.f32.mrb[19].mxu1 }
 0x21e   :  { %v621_v24 = vmax.f32 %v496_v25, 0.0 }
 0x21f   :  { %v653_v32 = vpack.c.bf16 %v623_v30, %v622_v29 }
 0x220   :  { %v652_v33 = vpack.c.bf16 %v621_v24, %v620_v31 }
 0x222   :  { %v1110_v34 = vpop.f32.mrb[20].mxu1  ;;  %1152 = vmatprep.mubr.bf16.mxu0 %v652_v33 }
 0x223   :  { %v509_v35 = vpop.f32.mrb[21].mxu1  ;;  %1153 = vmatmul.mubr.bf16.vlgmr.msra.gmra.mrb[16].mxu0 %v653_v32  ;;  %v626_v37 = vmax.f32 %v1110_v34, 0.0 }
 0x224   :  { %v1111_v36 = vpop.f32.mrb[22].mxu1  ;;  %v624_v40 = vmax.f32 %v509_v35, 0.0 }
 0x225   :  { %v627_v38 = vmax.f32 %v1111_v36, 0.0  ;;  %v512_v39 = vpop.f32.mrb[23].mxu1 }
 0x226   :  { %v625_v41 = vmax.f32 %v512_v39, 0.0 }
 0x227   :  { %v655_v42 = vpack.c.bf16 %v627_v38, %v626_v37 }
 0x228   :  { %v654_v43 = vpack.c.bf16 %v625_v41, %v624_v40 }
 0x22a   :  { %v1114_v44 = vpop.f32.mrb[24].mxu1  ;;  %1156 = vmatprep.mubr.bf16.mxu0 %v654_v43 }
 0x22b   :  { %v525_v45 = vpop.f32.mrb[25].mxu1  ;;  %1157 = vmatmul.mubr.bf16.gmra.mrb[20].mxu0 %v655_v42  ;;  %v630_v47 = vmax.f32 %v1114_v44, 0.0 }
 0x22c   :  { %v1115_v46 = vpop.f32.mrb[26].mxu1  ;;  %v628_v50 = vmax.f32 %v525_v45, 0.0 }
 0x22d   :  { %v631_v48 = vmax.f32 %v1115_v46, 0.0  ;;  %v528_v49 = vpop.f32.mrb[27].mxu1 }
 0x22e   :  { %v629_v51 = vmax.f32 %v528_v49, 0.0 }
 0x22f   :  { %v657_v52 = vpack.c.bf16 %v631_v48, %v630_v47 }
 0x230   :  { %v656_v53 = vpack.c.bf16 %v629_v51, %v628_v50 }
 0x232   :  { %v1118_v54 = vpop.f32.mrb[28].mxu1  ;;  %1160 = vmatprep.mubr.bf16.mxu0 %v656_v53 }
 0x233   :  { %v541_v55 = vpop.f32.mrb[29].mxu1  ;;  %1161 = vmatmul.mubr.bf16.gmra.mrb[24].mxu0 %v657_v52  ;;  %v634_v57 = vmax.f32 %v1118_v54, 0.0 }
 0x234   :  { %v1119_v56 = vpop.f32.mrb[30].mxu1  ;;  %v632_v60 = vmax.f32 %v541_v55, 0.0 }
 0x235   :  { %v635_v58 = vmax.f32 %v1119_v56, 0.0  ;;  %v544_v59 = vpop.f32.mrb[31].mxu1 }
 0x236   :  { %v633_v61 = vmax.f32 %v544_v59, 0.0 }
 0x237   :  { %v659_v62 = vpack.c.bf16 %v635_v58, %v634_v57 }
 0x238   :  { %v658_v63 = vpack.c.bf16 %v633_v61, %v632_v60 }
 0x23a   :  { %v1122_v0 = vpop.f32.mrb[32].mxu1  ;;  %1164 = vmatprep.mubr.bf16.mxu0 %v658_v63 }
 0x23b   :  { %v557_v1 = vpop.f32.mrb[33].mxu1  ;;  %1165 = vmatmul.mubr.bf16.gmra.mrb[28].mxu0 %v659_v62  ;;  %v638_v3 = vmax.f32 %v1122_v0, 0.0 }
 0x23c   :  { %v1123_v2 = vpop.f32.mrb[34].mxu1  ;;  %v636_v6 = vmax.f32 %v557_v1, 0.0 }
 0x23d   :  { %v639_v4 = vmax.f32 %v1123_v2, 0.0  ;;  %v560_v5 = vpop.f32.mrb[35].mxu1 }
 0x23e   :  { %v637_v7 = vmax.f32 %v560_v5, 0.0 }
 0x23f   :  { %v661_v8 = vpack.c.bf16 %v639_v4, %v638_v3 }
 0x240   :  { %v660_v9 = vpack.c.bf16 %v637_v7, %v636_v6 }
 0x242   :  { %v1126_v10 = vpop.f32.mrb[36].mxu1  ;;  %1168 = vmatprep.mubr.bf16.mxu0 %v660_v9 }
 0x243   :  { %v573_v11 = vpop.f32.mrb[37].mxu1  ;;  %1169 = vmatmul.mubr.bf16.gmra.mrb[32].mxu0 %v661_v8  ;;  %v642_v13 = vmax.f32 %v1126_v10, 0.0 }
 0x244   :  { %v1127_v12 = vpop.f32.mrb[38].mxu1  ;;  %v640_v16 = vmax.f32 %v573_v11, 0.0 }
 0x245   :  { %v643_v14 = vmax.f32 %v1127_v12, 0.0  ;;  %v576_v15 = vpop.f32.mrb[39].mxu1 }
 0x246   :  { %v641_v17 = vmax.f32 %v576_v15, 0.0 }
 0x247   :  { %v663_v18 = vpack.c.bf16 %v643_v14, %v642_v13 }
 0x248   :  { %v662_v19 = vpack.c.bf16 %v641_v17, %v640_v16 }
 0x24a   :  { %v1130_v20 = vpop.f32.mrb[40].mxu1  ;;  %1172 = vmatprep.mubr.bf16.mxu0 %v662_v19 }
 0x24b   :  { %v589_v21 = vpop.f32.mrb[41].mxu1  ;;  %1173 = vmatmul.mubr.bf16.gmra.mrb[36].mxu0 %v663_v18  ;;  %v646_v23 = vmax.f32 %v1130_v20, 0.0 }
 0x24c   :  { %v1131_v22 = vpop.f32.mrb[42].mxu1  ;;  %v644_v28 = vmax.f32 %v589_v21, 0.0 }
 0x24d   :  { %v647_v26 = vmax.f32 %v1131_v22, 0.0  ;;  %v592_v27 = vpop.f32.mrb[43].mxu1 }
 0x24e   :  { %v645_v29 = vmax.f32 %v592_v27, 0.0 }
 0x24f   :  { %v665_v30 = vpack.c.bf16 %v647_v26, %v646_v23 }
 0x250   :  { %v664_v25 = vpack.c.bf16 %v645_v29, %v644_v28 }
 0x252   :  { %v1134_v31 = vpop.f32.mrb[44].mxu1  ;;  %1176 = vmatprep.mubr.bf16.mxu0 %v664_v25 }
 0x253   :  { %v605_v24 = vpop.f32.mrb[45].mxu1  ;;  %1177 = vmatmul.mubr.bf16.gmra.mrb[40].mxu0 %v665_v30  ;;  %v650_v33 = vmax.f32 %v1134_v31, 0.0 }
 0x254   :  { %v1135_v32 = vpop.f32.mrb[46].mxu1  ;;  %v648_v36 = vmax.f32 %v605_v24, 0.0 }
 0x255   :  { %v651_v34 = vmax.f32 %v1135_v32, 0.0  ;;  %v608_v35 = vpop.f32.mrb[47].mxu1 }
 0x256   :  { %v649_v37 = vmax.f32 %v608_v35, 0.0 }
 0x257   :  { %v667_v38 = vpack.c.bf16 %v651_v34, %v650_v33 }
 0x258   :  { %v666_v39 = vpack.c.bf16 %v649_v37, %v648_v36 }
 0x25a   :  { %1180 = vmatprep.mubr.bf16.mxu0 %v666_v39 }
 0x25b   :  { %1181 = vmatmul.mubr.bf16.gmra.mrb[44].mxu0 %v667_v38 }
 0x2f6   :  { %v1154_v40 = vpop.f32.mrb[16].mxu0 }
 0x2f7   :  { %895 = vst [vmem:[#allocation10 + $0x10] sm:$0xff] %v1154_v40  ;;  %v766_v41 = vpop.f32.mrb[17].mxu0 }
 0x2f8   :  { %893 = vst [vmem:[#allocation10] sm:$0xff] %v766_v41  ;;  %v1155_v42 = vpop.f32.mrb[18].mxu0 }
 0x2f9   :  { %896 = vst [vmem:[#allocation10 + $0x18] sm:$0xff] %v1155_v42  ;;  %v769_v43 = vpop.f32.mrb[19].mxu0 }
 0x2fa   :  { %894 = vst [vmem:[#allocation10 + $0x8] sm:$0xff] %v769_v43 }
 0x2fe   :  { %v1158_v44 = vpop.f32.mrb[20].mxu0 }
 0x2ff   :  { %899 = vst [vmem:[#allocation10 + $0x30] sm:$0xff] %v1158_v44  ;;  %v782_v45 = vpop.f32.mrb[21].mxu0 }
 0x300   :  { %897 = vst [vmem:[#allocation10 + $0x20] sm:$0xff] %v782_v45  ;;  %v1159_v46 = vpop.f32.mrb[22].mxu0 }
 0x301   :  { %900 = vst [vmem:[#allocation10 + $0x38] sm:$0xff] %v1159_v46  ;;  %v785_v47 = vpop.f32.mrb[23].mxu0 }
 0x302   :  { %898 = vst [vmem:[#allocation10 + $0x28] sm:$0xff] %v785_v47 }
 0x306   :  { %v1162_v48 = vpop.f32.mrb[24].mxu0 }
 0x307   :  { %903 = vst [vmem:[#allocation10 + $0x50] sm:$0xff] %v1162_v48  ;;  %v798_v49 = vpop.f32.mrb[25].mxu0 }
 0x308   :  { %901 = vst [vmem:[#allocation10 + $0x40] sm:$0xff] %v798_v49  ;;  %v1163_v50 = vpop.f32.mrb[26].mxu0 }
 0x309   :  { %904 = vst [vmem:[#allocation10 + $0x58] sm:$0xff] %v1163_v50  ;;  %v801_v51 = vpop.f32.mrb[27].mxu0 }
 0x30a   :  { %902 = vst [vmem:[#allocation10 + $0x48] sm:$0xff] %v801_v51 }
 0x30e   :  { %v1166_v52 = vpop.f32.mrb[28].mxu0 }
 0x30f   :  { %907 = vst [vmem:[#allocation10 + $0x70] sm:$0xff] %v1166_v52  ;;  %v814_v53 = vpop.f32.mrb[29].mxu0 }
 0x310   :  { %905 = vst [vmem:[#allocation10 + $0x60] sm:$0xff] %v814_v53  ;;  %v1167_v54 = vpop.f32.mrb[30].mxu0 }
 0x311   :  { %908 = vst [vmem:[#allocation10 + $0x78] sm:$0xff] %v1167_v54  ;;  %v817_v55 = vpop.f32.mrb[31].mxu0 }
 0x312   :  { %906 = vst [vmem:[#allocation10 + $0x68] sm:$0xff] %v817_v55 }
 0x316   :  { %v1170_v56 = vpop.f32.mrb[32].mxu0 }
 0x317   :  { %911 = vst [vmem:[#allocation10 + $0x90] sm:$0xff] %v1170_v56  ;;  %v830_v57 = vpop.f32.mrb[33].mxu0 }
 0x318   :  { %909 = vst [vmem:[#allocation10 + $0x80] sm:$0xff] %v830_v57  ;;  %v1171_v58 = vpop.f32.mrb[34].mxu0 }
 0x319   :  { %912 = vst [vmem:[#allocation10 + $0x98] sm:$0xff] %v1171_v58  ;;  %v833_v59 = vpop.f32.mrb[35].mxu0 }
 0x31a   :  { %910 = vst [vmem:[#allocation10 + $0x88] sm:$0xff] %v833_v59 }
 0x31e   :  { %v1174_v60 = vpop.f32.mrb[36].mxu0 }
 0x31f   :  { %915 = vst [vmem:[#allocation10 + $0xb0] sm:$0xff] %v1174_v60  ;;  %v846_v61 = vpop.f32.mrb[37].mxu0 }
 0x320   :  { %913 = vst [vmem:[#allocation10 + $0xa0] sm:$0xff] %v846_v61  ;;  %v1175_v62 = vpop.f32.mrb[38].mxu0 }
 0x321   :  { %916 = vst [vmem:[#allocation10 + $0xb8] sm:$0xff] %v1175_v62  ;;  %v849_v63 = vpop.f32.mrb[39].mxu0 }
 0x322   :  { %914 = vst [vmem:[#allocation10 + $0xa8] sm:$0xff] %v849_v63 }
 0x326   :  { %v1178_v0 = vpop.f32.mrb[40].mxu0 }
 0x327   :  { %919 = vst [vmem:[#allocation10 + $0xd0] sm:$0xff] %v1178_v0  ;;  %v862_v1 = vpop.f32.mrb[41].mxu0 }
 0x328   :  { %917 = vst [vmem:[#allocation10 + $0xc0] sm:$0xff] %v862_v1  ;;  %v1179_v2 = vpop.f32.mrb[42].mxu0 }
 0x329   :  { %920 = vst [vmem:[#allocation10 + $0xd8] sm:$0xff] %v1179_v2  ;;  %v865_v3 = vpop.f32.mrb[43].mxu0 }
 0x32a   :  { %918 = vst [vmem:[#allocation10 + $0xc8] sm:$0xff] %v865_v3 }
 0x32e   :  { %v1182_v4 = vpop.f32.mrb[44].mxu0 }
 0x32f   :  { %923 = vst [vmem:[#allocation10 + $0xf0] sm:$0xff] %v1182_v4  ;;  %v878_v5 = vpop.f32.mrb[45].mxu0 }
 0x330   :  { %921 = vst [vmem:[#allocation10 + $0xe0] sm:$0xff] %v878_v5  ;;  %v1183_v6 = vpop.f32.mrb[46].mxu0 }
 0x331   :  { %924 = vst [vmem:[#allocation10 + $0xf8] sm:$0xff] %v1183_v6  ;;  %v881_v7 = vpop.f32.mrb[47].mxu0 }
 0x332   :  { %922 = vst [vmem:[#allocation10 + $0xe8] sm:$0xff] %v881_v7 }
 0x333   :  { %1332 = shalt.err (!%p1329_p8)
}
 0x334   :  { %s1333_s17 = scalar_lea.hbm %s1477_s4, 4096 }
 0x335   :  { %p1334_p9 = scmp.ne.s32.totalorder %s1477_s4, %s1333_s17  ;;  %p1337_p10 = scmp.lt.u32.totalorder %s1333_s17, %s1477_s4 }
 0x337   :  { %p1339_p11 = pnand %p1337_p10, %p1334_p9 }
 0x339   :  { %1342 = shalt.err (!%p1339_p11)
}
 0x33a   :  { %936 = dma.vmem_to_hbm [thread:$0]  %s931_s25, 4096, %s1477_s4, [#allocation4], %s1355_s1, %s1355_s1, %s1356_s13  }
 0x33b   :  { %1349 = dma.done.wait [#allocation4], 4096  }
 0x33c   :  { %1350 = vsyncadd [#allocation4], 4294963200 }
 0x33d   :  { %940 = vsyncpa [#allocation3], 1 }
 0x33e   :  { %941 = vsyncpa [#allocation6], 1 }
 0x33f   :  { %942 = vsyncpa [#allocation9], 1 }
 0x340   :  { %943 = vsyncpa [#allocation4], 1 }

</bundles_post_ra>
